<compile_context>
chip_gen: v6e
topology: v6e:2x2x1
jax: 0.10.0
libtpu: 0.0.40
codegen_flags: <defaults>
</compile_context>

<pallas_src>
import functools

import jax
import jax.numpy as jnp
from jax import lax
from jax.experimental import pallas as pl
from jax.experimental.pallas import tpu as pltpu

_LANE = 128
_SUBLANE = 8


def _round_up(x, m):
    return (x + m - 1) // m * m


# --------------------------------------------------------------------------
# Stage 1: hoisted input projection  px = xs @ Wx + b   (fully parallel GEMM)
# --------------------------------------------------------------------------
def _input_proj_kernel(xs_ref, wx_ref, b_ref, px_ref):
    px_ref[...] = (
        jnp.dot(xs_ref[...], wx_ref[...], preferred_element_type=jnp.float32)
        + b_ref[...]
    ).astype(px_ref.dtype)


# --------------------------------------------------------------------------
# Stage 2: serial recurrence over time, TC steps per grid iteration
# --------------------------------------------------------------------------
def _rnn_seq_kernel(px_ref, h0_ref, whh_ref, out_ref, h_scr,
                    *, hidden_size, output_size, steps):
    t = pl.program_id(0)

    @pl.when(t == 0)
    def _init():
        h_scr[...] = h0_ref[...]          # (b_pad, n_pad), hidden in cols [0, H)

    H, O = hidden_size, output_size

    # Hoisted (once per grid iteration, not per time step): column masks.
    col = lax.broadcasted_iota(jnp.int32, h_scr.shape, 1)
    is_hidden = col < H
    is_logit = jnp.logical_and(col >= H, col < H + O)

    whh = whh_ref[...]                    # resident (n_pad, n_pad) weight tile
    h = h_scr[...]

    # Fully-unrolled inner time loop (TC is small and static).
    for s in range(steps):
        # Short carried dependency chain: matmul + add + select only.
        z = px_ref[s] + jnp.dot(h, whh, preferred_element_type=jnp.float32)
        h_new = jnp.where(is_hidden, z, 0.0)   # carry mask; Whh rows [H:] are 0 too

        # log-softmax restricted to real logit columns (off the carry path).
        masked = jnp.where(is_logit, z, -jnp.inf)
        m = jnp.max(masked, axis=-1, keepdims=True)
        e = jnp.exp(masked - m)                # exactly 0 on non-logit lanes
        lse = jnp.log(jnp.sum(e, axis=-1, keepdims=True))
        logp = z - m - lse

        # Packed lane-dense output row: [ new_hidden | log_softmax(logits) | 0 ].
        out_ref[s] = jnp.where(is_logit, logp, h_new).astype(out_ref.dtype)
        h = h_new

    h_scr[...] = h                        # carry across grid iterations


def prepare_params(wh, bh, wo, bo, input_size):
    """Fuse i2h / i2o parameters into lane-padded, MXU-friendly operands.

    wh: (I+H, H), bh: (1, H), wo: (I+H, O), bo: (1, O)
    (weights stored as (in_features, out_features), i.e. transposed vs torch).
    """
    I = input_size
    H = wh.shape[1]
    O = wo.shape[1]
    n_pad = _round_up(max(H + O, _LANE), _LANE)

    wx = jnp.zeros((I, n_pad), jnp.float32)
    wx = wx.at[:, :H].set(wh[:I].astype(jnp.float32))
    wx = wx.at[:, H:H + O].set(wo[:I].astype(jnp.float32))

    # NOTE: rows [H:, :] of whh MUST stay zero — padded hidden lanes multiply them.
    whh = jnp.zeros((n_pad, n_pad), jnp.float32)
    whh = whh.at[:H, :H].set(wh[I:].astype(jnp.float32))
    whh = whh.at[:H, H:H + O].set(wo[I:].astype(jnp.float32))

    b = jnp.zeros((1, n_pad), jnp.float32)
    b = b.at[:, :H].set(jnp.reshape(bh, (1, H)).astype(jnp.float32))
    b = b.at[:, H:H + O].set(jnp.reshape(bo, (1, O)).astype(jnp.float32))

    return wx, whh, b, H, O


def rnn_sequence(xs, h0, wh, bh, wo, bo, *, time_block=16):
    """Run T RNN steps: parallel input projection + fused sequential recurrence.

    xs: (T, B, I), h0: (B, H).
    Returns (outputs: (T, B, O) log-softmax, hiddens: (T, B, H)).
    """
    T, B, I = xs.shape
    wx, whh, b, H, O = prepare_params(wh, bh, wo, bo, I)
    n_pad = wx.shape[1]
    b_pad = _round_up(max(B, _SUBLANE), _SUBLANE)

    TC = min(time_block, T)
    T_pad = _round_up(T, TC)
    n_blocks = T_pad // TC

    xs_p = jnp.zeros((T_pad, b_pad, I), jnp.float32).at[:T, :B, :].set(
        xs.astype(jnp.float32))
    h0_p = jnp.zeros((b_pad, n_pad), jnp.float32).at[:B, :H].set(
        h0.astype(jnp.float32))

    # ---- Stage 1: px = xs @ Wx + b over all time steps (parallel GEMM) ----
    rows = T_pad * b_pad
    row_tile = TC * b_pad
    xs_flat = xs_p.reshape(rows, I)

    px_flat = pl.pallas_call(
        _input_proj_kernel,
        out_shape=jax.ShapeDtypeStruct((rows, n_pad), jnp.float32),
        grid=(n_blocks,),
        in_specs=[
            pl.BlockSpec((row_tile, I), lambda r: (r, 0)),
            pl.BlockSpec((I, n_pad), lambda r: (0, 0)),     # Wx (resident)
            pl.BlockSpec((1, n_pad), lambda r: (0, 0)),     # bias (resident)
        ],
        out_specs=pl.BlockSpec((row_tile, n_pad), lambda r: (r, 0)),
        compiler_params=pltpu.CompilerParams(dimension_semantics=("parallel",)),
        cost_estimate=pl.CostEstimate(
            flops=2 * rows * I * n_pad,
            transcendentals=0,
            bytes_accessed=4 * (rows * I + I * n_pad + n_pad + rows * n_pad)),
    )(xs_flat, wx, b)
    px = px_flat.reshape(T_pad, b_pad, n_pad)

    # ---- Stage 2: sequential recurrence, TC time steps per grid iteration ----
    kernel = functools.partial(_rnn_seq_kernel, hidden_size=H, output_size=O,
                               steps=TC)

    cost = pl.CostEstimate(
        flops=2 * T_pad * b_pad * n_pad * n_pad,
        transcendentals=T_pad * b_pad * (n_pad + 1),
        bytes_accessed=4 * (px.size + h0_p.size + whh.size
                            + T_pad * b_pad * n_pad),
    )

    out = pl.pallas_call(
        kernel,
        out_shape=jax.ShapeDtypeStruct((T_pad, b_pad, n_pad), jnp.float32),
        grid=(n_blocks,),
        in_specs=[
            pl.BlockSpec((TC, b_pad, n_pad), lambda t: (t, 0, 0)),  # px block
            pl.BlockSpec((b_pad, n_pad), lambda t: (0, 0)),          # h0 (resident)
            pl.BlockSpec((n_pad, n_pad), lambda t: (0, 0)),          # Whh (resident)
        ],
        out_specs=pl.BlockSpec((TC, b_pad, n_pad), lambda t: (t, 0, 0)),
        scratch_shapes=[pltpu.VMEM((b_pad, n_pad), jnp.float32)],    # hidden carry
        compiler_params=pltpu.CompilerParams(
            dimension_semantics=("arbitrary",)),   # hidden carry => sequential
        cost_estimate=cost,
    )(px, h0_p, whh)

    hiddens = out[:T, :B, :H]
    outputs = out[:T, :B, H:H + O]
    return outputs, hiddens


def rnn_forward(x, h, wh, bh, wo, bo):
    """Single-step forward matching the PyTorch module: returns (output, hidden)."""
    outputs, hiddens = rnn_sequence(x[None], h, wh, bh, wo, bo)
    return outputs[0], hiddens[0]


def _reference_step(x, h, wh, bh, wo, bo):
    combined = jnp.concatenate([x, h], axis=1)
    hid = combined @ wh + bh
    logits = combined @ wo + bo
    return jax.nn.log_softmax(logits, axis=1), hid


if __name__ == "__main__":
    batch = 2
    input_size = 16
    hidden_size = 32
    output_size = 10
    seq = 8

    key = jax.random.PRNGKey(0)
    k_x, k_wh, k_bh, k_wo, k_bo = jax.random.split(key, 5)

    F = input_size + hidden_size
    bound = 1.0 / (F ** 0.5)
    wh = jax.random.uniform(k_wh, (F, hidden_size), jnp.float32, -bound, bound)
    bh = jax.random.uniform(k_bh, (1, hidden_size), jnp.float32, -bound, bound)
    wo = jax.random.uniform(k_wo, (F, output_size), jnp.float32, -bound, bound)
    bo = jax.random.uniform(k_bo, (1, output_size), jnp.float32, -bound, bound)

    xs = jax.random.normal(k_x, (seq, batch, input_size), dtype=jnp.float32)
    h0 = jnp.zeros((batch, hidden_size), dtype=jnp.float32)

    # ---- single-step (the module's forward) ----
    out1, hid1 = rnn_forward(xs[0], h0, wh, bh, wo, bo)
    jax.block_until_ready((out1, hid1))
    out1_ref, hid1_ref = _reference_step(xs[0], h0, wh, bh, wo, bo)
    assert jnp.allclose(hid1, hid1_ref, atol=1e-4, rtol=1e-4), "step hidden mismatch"
    assert jnp.allclose(out1, out1_ref, atol=1e-4, rtol=1e-4), "step output mismatch"

    # ---- fused sequence (T steps across the blocked recurrence) ----
    outs, hids = rnn_sequence(xs, h0, wh, bh, wo, bo)
    jax.block_until_ready((outs, hids))

    h = h0
    ref_outs, ref_hids = [], []
    for t in range(seq):
        o, h = _reference_step(xs[t], h, wh, bh, wo, bo)
        ref_outs.append(o)
        ref_hids.append(h)
    ref_outs = jnp.stack(ref_outs)
    ref_hids = jnp.stack(ref_hids)

    assert jnp.allclose(hids, ref_hids, atol=1e-4, rtol=1e-4), "seq hidden mismatch"
    assert jnp.allclose(outs, ref_outs, atol=1e-4, rtol=1e-4), "seq output mismatch"

    print("KERNEL_OK")
</pallas_src>

<mosaic_0001>
module attributes {stable_mosaic.version = 11 : i64} {
  func.func @_input_proj_kernel(%arg0: i32, %arg1: memref<8x16xf32, #tpu.memory_space<vmem>>, %arg2: memref<16x128xf32, #tpu.memory_space<vmem>>, %arg3: memref<1x128xf32, #tpu.memory_space<vmem>>, %arg4: memref<8x128xf32, #tpu.memory_space<vmem>>) attributes {dimension_semantics = [#tpu.dimension_semantics<parallel>], iteration_bounds = array<i64: 1>, scalar_prefetch = 0 : i64, scratch_operands = 0 : i64, tpu.core_type = #tpu.core_type<tc>, window_params = [{transform_indices = @transform_0, window_bounds = array<i64: 8, 16>}, {pipeline_mode = #tpu.pipeline_mode<synchronous>, transform_indices = @transform_1, window_bounds = array<i64: 16, 128>}, {pipeline_mode = #tpu.pipeline_mode<synchronous>, transform_indices = @transform_2, window_bounds = array<i64: 1, 128>}, {transform_indices = @transform_3, window_bounds = array<i64: 8, 128>}]} {
    %c0 = arith.constant 0 : index
    %c0_0 = arith.constant 0 : index
    %0 = vector.load %arg1[%c0, %c0_0] : memref<8x16xf32, #tpu.memory_space<vmem>>, vector<8x16xf32>
    %c0_1 = arith.constant 0 : index
    %c0_2 = arith.constant 0 : index
    %1 = vector.load %arg2[%c0_1, %c0_2] : memref<16x128xf32, #tpu.memory_space<vmem>>, vector<16x128xf32>
    %cst = arith.constant dense<0.000000e+00> : vector<8x128xf32>
    %2 = tpu.matmul %0, %1, %cst {dimension_numbers = #tpu.dot_dimension_numbers<[1], [0], [0], [1], [0, 0, 1, 1], [], []>} : vector<8x16xf32>, vector<16x128xf32>, vector<8x128xf32> -> vector<8x128xf32>
    %c0_3 = arith.constant 0 : index
    %c0_4 = arith.constant 0 : index
    %3 = vector.load %arg3[%c0_3, %c0_4] : memref<1x128xf32, #tpu.memory_space<vmem>>, vector<1x128xf32>
    %4 = vector.broadcast %3 : vector<1x128xf32> to vector<8x128xf32>
    %5 = arith.addf %2, %4 : vector<8x128xf32>
    %c0_5 = arith.constant 0 : index
    %c0_6 = arith.constant 0 : index
    %6 = vector.load %arg4[%c0_5, %c0_6] : memref<8x128xf32, #tpu.memory_space<vmem>>, vector<8x128xf32>
    tpu.vector_store %arg4[%c0_5, %c0_6], %5 {strides = array<i32>} : memref<8x128xf32, #tpu.memory_space<vmem>>, vector<8x128xf32>,
    return
  }
  func.func @transform_0(%arg0: i32) -> (i32, i32) {
    %c0_i32 = arith.constant 0 : i32
    %c0_i32_0 = arith.constant 0 : i32
    return %arg0, %c0_i32 : i32, i32
  }
  func.func @transform_1(%arg0: i32) -> (i32, i32) {
    %c0_i32 = arith.constant 0 : i32
    %c0_i32_0 = arith.constant 0 : i32
    %c0_i32_1 = arith.constant 0 : i32
    return %c0_i32, %c0_i32_0 : i32, i32
  }
  func.func @transform_2(%arg0: i32) -> (i32, i32) {
    %c0_i32 = arith.constant 0 : i32
    %c0_i32_0 = arith.constant 0 : i32
    %c0_i32_1 = arith.constant 0 : i32
    return %c0_i32, %c0_i32_0 : i32, i32
  }
  func.func @transform_3(%arg0: i32) -> (i32, i32) {
    %c0_i32 = arith.constant 0 : i32
    %c0_i32_0 = arith.constant 0 : i32
    return %arg0, %c0_i32 : i32, i32
  }
}

</mosaic_0001>

<bundles_post_ra>
// kernel: tpu_custom_call.1
= control target key start
LH: loop header
LB: loop body
LE: loop exit
PB: predicated region body
PF: predicated region fallthrough
CT: control target
= control target key end

     0   :  { %8 = vsyncpa [#allocation3], 0  ;;  %s266_s0 = inlined_call_operand.hbm [shape: f32[8,16], index: 0, kind: input, shape index: {}]   ;;  %s267_s1 = inlined_call_operand.hbm [shape: f32[16,128], index: 1, kind: input, shape index: {}]   ;;  %s268_s2 = inlined_call_operand.vmem [shape: f32[1,128], index: 2, kind: input, shape index: {}]   ;;  %s269_s3 = inlined_call_operand.hbm [shape: f32[8,128], index: 3, kind: output, shape index: {}]  }
   0x1   :  { %9 = vsyncpa [#allocation6], 0 }
   0x2   :  { %10 = vsyncpa [#allocation4], 0  ;;  %s227_s12 = smov [#allocation2]   ;;  %s228_s14 = smov [#allocation5]  }
   0x3   :  { %s17_s13 = sshll.u32 %s227_s12, 4  ;;  %s26_s15 = sshll.u32 %s228_s14, 4  ;;  %s18_s13 = int_to_ptr.vmem [resolvable:$true] %s17_s13  ;;  %s27_s15 = int_to_ptr.vmem [resolvable:$true] %s26_s15 }
   0x4   :  { %s169_s16 = scalar_lea.vmem %s18_s13, 128  ;;  %p174_p1 = scmp.lt.s32.totalorder %s18_s13, %s18_s13 }
   0x5   :  { %p170_p0 = scmp.ne.s32.totalorder %s18_s13, %s169_s16  ;;  %p175_p2 = scmp.lt.s32.totalorder %s169_s16, %s169_s16 }
   0x7   :  { %p176_p3 = por %p175_p2, %p174_p1 }
   0x9   :  { %p177_p4 = pnand %p176_p3, %p170_p0 }
   0xb   :  { %180 = shalt.err (!%p177_p4)
}
   0xc   :  { %20 = dma.hbm_to_vmem [thread:$0]  %s266_s0, 128, %s18_s13, [#allocation3]  }
   0xd   :  { %s189_s19 = scalar_lea.vmem %s27_s15, 256  ;;  %p194_p6 = scmp.lt.s32.totalorder %s27_s15, %s27_s15 }
   0xe   :  { %p190_p5 = scmp.ne.s32.totalorder %s27_s15, %s189_s19  ;;  %p195_p7 = scmp.lt.s32.totalorder %s189_s19, %s189_s19 }
  0x10   :  { %p196_p8 = por %p195_p7, %p194_p6 }
  0x12   :  { %p197_p9 = pnand %p196_p8, %p190_p5 }
  0x14   :  { %200 = shalt.err (!%p197_p9)
}
  0x15   :  { %s229_s20 = smov 128   ;;  %s230_s21 = smov 8  }
  0x16   :  { %32 = dma.hbm_to_vmem [thread:$0]  %s267_s1, 256, %s27_s15, [#allocation6], %s229_s20, %s229_s20, %s230_s21  }
  0x17   :  { %221 = dma.done.wait [#allocation3], 128  }
  0x18   :  { %222 = vsyncadd [#allocation3], 4294967168 }
  0x19   :  { %223 = dma.done.wait [#allocation6], 256  }
  0x1a   :  { %224 = vsyncadd [#allocation6], 4294967040  ;;  %v231_v0 = vmov 0.0   ;;  %vm232_vm0 = vmmov 0   ;;  %v43_v1 = vld [vmem:[#allocation5 + $0x8] sm:$0xff]  ;;  %v42_v2 = vld [vmem:[#allocation5] sm:$0xff] }
  0x1b   :  { %147 = vmatprep.subr.mxu0 %v231_v0  ;;  %151 = vmatprep.mubr.msk.f32.mxu0 %vm232_vm0, %v231_v0  ;;  %v41_v3 = vld [vmem:[#allocation2] sm:$0xff]  ;;  %vm51_vm1 = vcmask 130048   ;;  %s233_s1 = smov [#allocation7]  }
  0x1c   :  { %148 = vmatpush3.msra.mxu0 %v43_v1  ;;  %v142_v4 = vld [vmem:[%s268_s2] ss:$0 sm:$0xff]  ;;  %s132_s25 = sshll.u32 %s233_s1, 4  ;;  %s133_s25 = int_to_ptr.vmem [resolvable:$true] %s132_s25 }
  0x1d   :  { %149 = vmatprep.subr.mxu0 %v231_v0  ;;  %s201_s26 = scalar_lea.vmem %s133_s25, 128  ;;  %p206_p11 = scmp.lt.s32.totalorder %s133_s25, %s133_s25 }
  0x1e   :  { %150 = vmatpush3.msra.mxu0 %v42_v2  ;;  %p202_p10 = scmp.ne.s32.totalorder %s133_s25, %s201_s26  ;;  %p207_p12 = scmp.lt.s32.totalorder %s201_s26, %s201_s26 }
  0x1f   :  { %152 = vmatmul.mubr.msk.f32.vlgmr.msra.gmra.mxu0 %vm51_vm1, %v41_v3 }
  0x20   :  { %p208_p13 = por %p207_p12, %p206_p11 }
  0x22   :  { %p209_p0 = pnand %p208_p13, %p202_p10 }
  0xdf   :  { %v121_v5 = vpop.f32.mrf.mxu0 }
  0xe0   :  { %v122_v6 = vadd.f32 %v142_v4, %v121_v5 }
  0xe1   :  { %v153_v7 = vpop.f32.mrf.mxu0 }
  0xe2   :  { %125 = vst [vmem:[#allocation7] sm:$0xff] %v122_v6 }
  0xe3   :  { %212 = shalt.err (!%p209_p0)
}
  0xe4   :  { %135 = dma.vmem_to_hbm [thread:$0]  %s133_s25, 128, %s269_s3, [#allocation4]  }
  0xe5   :  { %225 = dma.done.wait [#allocation4], 128  }
  0xe6   :  { %226 = vsyncadd [#allocation4], 4294967168 }
  0xe7   :  { %139 = vsyncpa [#allocation3], 1 }
  0xe8   :  { %140 = vsyncpa [#allocation6], 1 }
  0xe9   :  { %141 = vsyncpa [#allocation4], 1 }

</bundles_post_ra>
